<compile_context>
chip_gen: v7x
topology: tpu7x:2x2x1
jax: 0.10.0
libtpu: 0.0.40
codegen_flags: <defaults>
</compile_context>

<pallas_src>
import functools

import jax
import jax.numpy as jnp
from jax.experimental import pallas as pl
from jax.experimental.pallas import tpu as pltpu


def _gcn_agg_kernel(adj_ref, h_ref, o_ref, *, kernel_size):
    # adj_ref: (TB, K, TW, V)   compute dtype (bf16)
    # h_ref:   (TB, K, V, C_out)
    # o_ref:   (TB, TW, C_out)  output dtype (f32)
    adj = adj_ref[...]
    h = h_ref[...]
    acc = jnp.zeros(o_ref.shape, dtype=jnp.float32)
    for k in range(kernel_size):  # K is small & static -> unrolled
        acc = acc + jnp.einsum(
            "bwv,bvc->bwc", adj[:, k], h[:, k],
            preferred_element_type=jnp.float32)
    o_ref[...] = jnp.maximum(acc, 0.0).astype(o_ref.dtype)  # ReLU


def _pick_block_b(B, max_tb=8):
    """Largest divisor of B <= max_tb, preferring >=2 grid steps (v7x megacore)."""
    divisors = [t for t in range(1, min(B, max_tb) + 1) if B % t == 0]
    two_plus = [t for t in divisors if B // t >= 2]
    return max(two_plus if two_plus else divisors)


def gcn_layer(x, adj, weight, bias, *, kernel_size,
              compute_dtype=jnp.bfloat16, block_b=None, block_w=None):
    """x: (B,V,C_in), adj: (B,K,V,V), weight: (K,C_in,C_out), bias: (K,C_out)."""
    B, V, C_in = x.shape
    K, _, C_out = weight.shape
    assert adj.shape == (B, K, V, V)
    assert K == kernel_size

    # ---- projection (1x1 conv == GEMM), fused across K kernels, in plain XLA -----
    w_cat = jnp.transpose(weight, (1, 0, 2)).reshape(C_in, K * C_out)
    h = jnp.dot(x.reshape(B * V, C_in).astype(compute_dtype),
                w_cat.astype(compute_dtype),
                preferred_element_type=jnp.float32)                  # (B*V, K*C_out)
    h = h.reshape(B, V, K, C_out) + bias[None, None, :, :].astype(jnp.float32)
    h = jnp.transpose(h, (0, 2, 1, 3)).astype(compute_dtype)         # (B, K, V, C_out)

    adj_c = adj.astype(compute_dtype)

    # ---- blocking for the Pallas aggregation kernel ------------------------------
    TB = block_b if block_b is not None else _pick_block_b(B)
    TW = block_w if block_w is not None else V  # tile W (multiple of 8) at large V
    assert B % TB == 0 and V % TW == 0
    assert TW == V or TW % 8 == 0, "W tile must be sublane aligned"
    grid = (B // TB, V // TW)

    kernel = functools.partial(_gcn_agg_kernel, kernel_size=K)
    return pl.pallas_call(
        kernel,
        out_shape=jax.ShapeDtypeStruct((B, V, C_out), x.dtype),
        grid_spec=pltpu.PrefetchScalarGridSpec(
            num_scalar_prefetch=0,
            grid=grid,
            in_specs=[
                pl.BlockSpec((TB, K, TW, V), lambda b, w: (b, 0, w, 0)),
                pl.BlockSpec((TB, K, V, C_out), lambda b, w: (b, 0, 0, 0)),
            ],
            out_specs=pl.BlockSpec((TB, TW, C_out), lambda b, w: (b, w, 0)),
        ),
        compiler_params=pltpu.CompilerParams(
            # Both grid axes are independent -> shard across v7x's two TensorCores.
            dimension_semantics=("parallel", "parallel"),
        ),
    )(adj_c, h)


def gcn_layer_ref(x, adj, weight, bias):
    """Pure-JAX float32 reference mirroring the PyTorch forward."""
    h = jnp.einsum("bvi,kic->bkcv", x, weight) + bias[None, :, :, None]
    out = jnp.einsum("bkcv,bkwv->bcw", h, adj)
    out = jnp.maximum(out, 0.0)
    return jnp.transpose(out, (0, 2, 1))  # (B, V, C_out)


if __name__ == "__main__":
    # Small shapes consistent with the module.
    B, V = 8, 16          # batch (>=2 grid steps after TB batching), num nodes
    C_in, C_out = 8, 32   # in_features, out_features
    K = 2                 # kernel_size

    key = jax.random.PRNGKey(0)
    kx, ka, kw, kb = jax.random.split(key, 4)

    x = jax.random.normal(kx, (B, V, C_in), dtype=jnp.float32)
    adj = jax.random.uniform(ka, (B, K, V, V), dtype=jnp.float32)

    # Conv1d weight (K*C_out, C_in, 1) -> (K, C_in, C_out); bias (K*C_out,) -> (K, C_out).
    bound = 1.0 / (C_in ** 0.5)
    w_conv = jax.random.uniform(kw, (K * C_out, C_in), dtype=jnp.float32,
                                minval=-bound, maxval=bound)
    bias_conv = jax.random.uniform(kb, (K * C_out,), dtype=jnp.float32,
                                   minval=-bound, maxval=bound)
    weight = jnp.transpose(w_conv.reshape(K, C_out, C_in), (0, 2, 1))  # (K, C_in, C_out)
    bias = bias_conv.reshape(K, C_out)                                  # (K, C_out)

    out = gcn_layer(x, adj, weight, bias, kernel_size=K)
    out = jax.block_until_ready(out)

    ref = gcn_layer_ref(x, adj, weight, bias)
    assert out.shape == (B, V, C_out)
    # bf16 inputs + f32 accumulation: compare against f32 reference with bf16 tolerance.
    assert jnp.allclose(out, ref, atol=3e-2, rtol=3e-2), "mismatch vs reference"

    print("KERNEL_OK")
</pallas_src>

<mosaic_0001>
module attributes {stable_mosaic.version = 11 : i64} {
  func.func @_gcn_agg_kernel(%arg0: i32, %arg1: i32, %arg2: memref<4x2x16x16xbf16, #tpu.memory_space<vmem>>, %arg3: memref<4x2x16x32xbf16, #tpu.memory_space<vmem>>, %arg4: memref<4x16x32xf32, #tpu.memory_space<vmem>>) attributes {dimension_semantics = [#tpu.dimension_semantics<parallel>, #tpu.dimension_semantics<parallel>], iteration_bounds = array<i64: 2, 1>, scalar_prefetch = 0 : i64, scratch_operands = 0 : i64, tpu.core_type = #tpu.core_type<tc>, window_params = [{transform_indices = @transform_0, window_bounds = array<i64: 4, 2, 16, 16>}, {transform_indices = @transform_1, window_bounds = array<i64: 4, 2, 16, 32>}, {transform_indices = @transform_2, window_bounds = array<i64: 4, 16, 32>}]} {
    %c0 = arith.constant 0 : index
    %c0_0 = arith.constant 0 : index
    %c0_1 = arith.constant 0 : index
    %c0_2 = arith.constant 0 : index
    %0 = vector.load %arg2[%c0, %c0_0, %c0_1, %c0_2] : memref<4x2x16x16xbf16, #tpu.memory_space<vmem>>, vector<4x2x16x16xbf16>
    %c0_3 = arith.constant 0 : index
    %c0_4 = arith.constant 0 : index
    %c0_5 = arith.constant 0 : index
    %c0_6 = arith.constant 0 : index
    %1 = vector.load %arg3[%c0_3, %c0_4, %c0_5, %c0_6] : memref<4x2x16x32xbf16, #tpu.memory_space<vmem>>, vector<4x2x16x32xbf16>
    %cst = arith.constant 0.000000e+00 : f32
    %2 = vector.broadcast %cst : f32 to vector<4x16x32xf32>
    %3 = vector.extract_strided_slice %0 {offsets = [0, 0, 0, 0], sizes = [4, 1, 16, 16], strides = [1, 1, 1, 1]} : vector<4x2x16x16xbf16> to vector<4x1x16x16xbf16>
    %4 = vector.shape_cast %3 : vector<4x1x16x16xbf16> to vector<4x16x16xbf16>
    %5 = vector.extract_strided_slice %1 {offsets = [0, 0, 0, 0], sizes = [4, 1, 16, 32], strides = [1, 1, 1, 1]} : vector<4x2x16x32xbf16> to vector<4x1x16x32xbf16>
    %6 = vector.shape_cast %5 : vector<4x1x16x32xbf16> to vector<4x16x32xbf16>
    "tpu.trace_start"() <{level = 10 : i32, message = "bwv,bvc->bwc"}> : () -> ()
    %cst_7 = arith.constant dense<0.000000e+00> : vector<4x16x32xf32>
    %7 = tpu.matmul %4, %6, %cst_7 {dimension_numbers = #tpu.dot_dimension_numbers<[2], [1], [1], [2], [0, 0, 0, 1, 1, 2], [0], [0]>} : vector<4x16x16xbf16>, vector<4x16x32xbf16>, vector<4x16x32xf32> -> vector<4x16x32xf32>
    "tpu.trace_stop"() : () -> ()
    %8 = arith.addf %2, %7 : vector<4x16x32xf32>
    %9 = vector.extract_strided_slice %0 {offsets = [0, 1, 0, 0], sizes = [4, 1, 16, 16], strides = [1, 1, 1, 1]} : vector<4x2x16x16xbf16> to vector<4x1x16x16xbf16>
    %10 = vector.shape_cast %9 : vector<4x1x16x16xbf16> to vector<4x16x16xbf16>
    %11 = vector.extract_strided_slice %1 {offsets = [0, 1, 0, 0], sizes = [4, 1, 16, 32], strides = [1, 1, 1, 1]} : vector<4x2x16x32xbf16> to vector<4x1x16x32xbf16>
    %12 = vector.shape_cast %11 : vector<4x1x16x32xbf16> to vector<4x16x32xbf16>
    "tpu.trace_start"() <{level = 10 : i32, message = "bwv,bvc->bwc"}> : () -> ()
    %cst_8 = arith.constant dense<0.000000e+00> : vector<4x16x32xf32>
    %13 = tpu.matmul %10, %12, %cst_8 {dimension_numbers = #tpu.dot_dimension_numbers<[2], [1], [1], [2], [0, 0, 0, 1, 1, 2], [0], [0]>} : vector<4x16x16xbf16>, vector<4x16x32xbf16>, vector<4x16x32xf32> -> vector<4x16x32xf32>
    "tpu.trace_stop"() : () -> ()
    %14 = arith.addf %8, %13 : vector<4x16x32xf32>
    %cst_9 = arith.constant 0.000000e+00 : f32
    %15 = vector.broadcast %cst_9 : f32 to vector<4x16x32xf32>
    %16 = arith.maximumf %14, %15 : vector<4x16x32xf32>
    %c0_10 = arith.constant 0 : index
    %c0_11 = arith.constant 0 : index
    %c0_12 = arith.constant 0 : index
    %17 = vector.load %arg4[%c0_10, %c0_11, %c0_12] : memref<4x16x32xf32, #tpu.memory_space<vmem>>, vector<4x16x32xf32>
    tpu.vector_store %arg4[%c0_10, %c0_11, %c0_12], %16 {strides = array<i32>} : memref<4x16x32xf32, #tpu.memory_space<vmem>>, vector<4x16x32xf32>,
    return
  }
  func.func @transform_0(%arg0: i32, %arg1: i32) -> (i32, i32, i32, i32) {
    %c0_i32 = arith.constant 0 : i32
    %c0_i32_0 = arith.constant 0 : i32
    %c0_i32_1 = arith.constant 0 : i32
    return %arg0, %c0_i32, %arg1, %c0_i32_0 : i32, i32, i32, i32
  }
  func.func @transform_1(%arg0: i32, %arg1: i32) -> (i32, i32, i32, i32) {
    %c0_i32 = arith.constant 0 : i32
    %c0_i32_0 = arith.constant 0 : i32
    %c0_i32_1 = arith.constant 0 : i32
    %c0_i32_2 = arith.constant 0 : i32
    return %arg0, %c0_i32, %c0_i32_0, %c0_i32_1 : i32, i32, i32, i32
  }
  func.func @transform_2(%arg0: i32, %arg1: i32) -> (i32, i32, i32) {
    %c0_i32 = arith.constant 0 : i32
    %c0_i32_0 = arith.constant 0 : i32
    return %arg0, %arg1, %c0_i32 : i32, i32, i32
  }
}

</mosaic_0001>

<bundles_post_ra>
// kernel: tpu_custom_call.1
= control target key start
LH: loop header
LB: loop body
LE: loop exit
PB: predicated region body
PF: predicated region fallthrough
CT: control target
= control target key end

     0   :  { %7 = vsyncpa [#allocation3], 0  ;;  %s1523_s0 = inlined_call_operand.hbm [shape: bf16[8,2,16,16], index: 0, kind: input, shape index: {}]   ;;  %s1524_s1 = inlined_call_operand.hbm [shape: bf16[8,2,16,32], index: 1, kind: input, shape index: {}]   ;;  %s1525_s2 = inlined_call_operand.hbm [shape: f32[8,16,32], index: 2, kind: output, shape index: {}]  }
   0x1   :  { %9 = vsyncpa [#allocation3 + $0x1], 0 }
   0x2   :  { %10 = vsyncpa [#allocation6], 0 }
   0x3   :  { %12 = vsyncpa [#allocation6 + $0x1], 0 }
   0x4   :  { %13 = vsyncpa [#allocation4], 0 }
   0x5   :  { %15 = vsyncpa [#allocation4 + $0x1], 0  ;;  %s1238_s9 = smov 0   ;;  %s1240_s10 = smov 0  }
   0x6   :  { %s1242_s11 = smov 0   ;;  %s1244_s12 = smov 0  }
   0x7   :  { %s1246_s13 = smov 0   ;;  %s1248_s14 = smov 0  }
   0x8 LB: > { %s845_s15 = sadd.s32 4294967295, %s1212_s14   ;;  %s846_s16 = sadd.s32 4294967294, %s1212_s14   ;;  %s1212_s14 = sphi %s1248_s14, %s21_s14   ;;  %s1208_s13 = sphi %s1246_s13, %s1543_s13   ;;  %s1204_s12 = sphi %s1244_s12, %s1542_s12   ;;  %s1200_s11 = sphi %s1242_s11, %s1541_s11   ;;  %s1196_s10 = sphi %s1240_s10, %s1540_s10   ;;  %s1192_s9 = sphi %s1238_s9, %s1539_s9  }
   0x9   : > { %s33_s17 = sadd.s32 1, %s1208_s13  ;;  %s42_s18 = sadd.s32 1, %s1200_s11 }
   0xa   : > { %p35_p0 = scmp.ge.s32.totalorder %s33_s17, 2  ;;  %p49_p1 = scmp.ne.s32.totalorder %s1200_s11, %s1196_s10 }
   0xb   : > { %p50_p2 = scmp.eq.s32.totalorder %s1212_s14, 0  ;;  %p55_p3 = scmp.ne.s32.totalorder %s1196_s10, %s1192_s9 }
   0xc   : > { %s1545_s17 = smov (%p35_p0, %s33_s17), 0  ;;  %p56_p5 = scmp.eq.s32.totalorder %s845_s15, 0 }
   0xd   : > { %p1279_p4 = por %p50_p2, %p49_p1  ;;  %s37_s20 = ssub.s32 %s1208_s13, %s1545_s17 }
   0xe   : > { %p107_p6 = scmp.eq.s32.totalorder %s845_s15, 1  ;;  %p40_p7 = scmp.eq.s32.totalorder %s37_s20, 0 }
   0xf   : > { %p1285_p8 = por %p56_p5, %p55_p3  ;;  %p113_p10 = scmp.eq.s32.totalorder %s846_s16, 1 }
  0x10   : > { %p1289_p9 = por %p107_p6, %p49_p1  ;;  %p994_p13 = scmp.lt.s32.totalorder %s1212_s14, 2 }
  0x11   : > { %s1529_s21 = scalar_select %p1285_p8, 1, 0 }
  0x12   : > { %s1530_s22 = scalar_select %p1289_p9, 1, 0 }
  0x13   : > { %s1294_s23 = scalar_select %p40_p7, %s1200_s11, %s42_s18  }
  0x14   : > { %p1296_p11 = por %p113_p10, %p55_p3  ;;  %s1303_s25 = sand.u32 1, %s1200_s11  }
  0x15   : > { %s849_s26 = sshll.u32 %s1303_s25, 6  ;;  %s892_s27 = sshll.u32 %s1208_s13, 10 }
  0x16   : > { %s1531_s24 = scalar_select %p1296_p11, 1, 0 }
  0x17   : > { %s1312_s30 = scalar_lea.hbm %s1523_s0, %s892_s27  ;;  %s137_s3 = scalar_lea.vmem [#allocation2], %s849_s26 }
  0x18   : > { %s147_s4 = sshll.u32 %s137_s3, 4  ;;  %p1320_p0 = pnand %p994_p13, %p1279_p4  ;;  %s1316_s4 = int_to_ptr.vmem [resolvable:$true] %s147_s4 }
  0x19   : > { %s134_s6 = scalar_lea.sflag [#allocation3], %s1303_s25  ;;  %s1066_s7 = scalar_lea.hbm %s1312_s30, 1024 }
  0x1a   : > { %p1067_p2 = scmp.ne.s32.totalorder %s1312_s30, %s1066_s7  ;;  %p1068_p3 = pneg %p1320_p0 }
  0x1b   : > { %s1071_s16 = scalar_lea.hbm %s1523_s0, 2048  ;;  %p1072_p4 = scmp.lt.u32.totalorder %s1312_s30, %s1523_s0 }
  0x1c   : > { %p1069_p5 = pnand %p1068_p3, %p1067_p2  ;;  %p1073_p7 = scmp.lt.u32.totalorder %s1071_s16, %s1066_s7 }
  0x1d   : > { %p1075_p13 = scmp.lt.u32.totalorder %s1066_s7, %s1312_s30 }
  0x1e   : > { %p1070_p6 = pneg %p1069_p5  ;;  %p1074_p10 = por %p1073_p7, %p1072_p4 }
  0x20   : > { %p1076_p12 = por %p1075_p13, %p1074_p10 }
  0x22   : > { %p1077_p1 = pnand %p1076_p12, %p1070_p6 }
  0x24   : > { %1080 = shalt.err (!%p1077_p1)
}
  0x25   : > { %s1081_s20 = scalar_lea.vmem %s1316_s4, 1024  ;;  %s1214_s28 = smov [#allocation2]  }
  0x26   : > { %p1082_p2 = scmp.ne.s32.totalorder %s1316_s4, %s1081_s20  ;;  %s1086_s29 = sshll.u32 %s1214_s28, 4  ;;  %s1087_s29 = int_to_ptr.vmem [resolvable:$false] %s1086_s29 }
  0x27   : > { %s1088_s3 = scalar_lea.vmem %s1087_s29, 2048  ;;  %p1089_p9 = scmp.lt.s32.totalorder %s1316_s4, %s1087_s29 }
  0x28   : > { %p1084_p5 = pnand %p1082_p2, %p1068_p3  ;;  %p1090_p4 = scmp.lt.s32.totalorder %s1088_s3, %s1081_s20 }
  0x2a   : > { %p1085_p11 = pneg %p1084_p5  ;;  %p1091_p7 = por %p1090_p4, %p1089_p9 }
  0x2c   : > { %p1092_p10 = pnand %p1091_p7, %p1085_p11 }
  0x2e   : > { %1095 = shalt.err (!%p1092_p10)
}
  0x2f   : > { %s1215_s7 = smov 64   ;;  %s1216_s8 = smov 4  }
  0x30   : > { %986 = dma.hbm_to_vmem [thread:$0]  (!%p1320_p0), %s1312_s30, 1024, %s1316_s4, %s134_s6, %s1215_s7, %s1215_s7, %s1216_s8  }
  0x31   : > { %p177_p9 = scmp.lt.s32.totalorder %s1212_s14, 3  ;;  %s1362_s18 = scalar_lea.hbm %s1524_s1, %s892_s27 }
  0x32   : > { %p1533_p11 = scmp.ge.s32.totalorder %s1212_s14, 1  ;;  %s161_s20 = scalar_lea.vmem [#allocation5], %s849_s26 }
  0x33   : > { %s169_s28 = sshll.u32 %s161_s20, 4  ;;  %s158_s30 = scalar_lea.sflag [#allocation6], %s1303_s25  ;;  %s1372_s28 = int_to_ptr.vmem [resolvable:$true] %s169_s28 }
  0x34   : > { %p1366_p12 = pnand %p1533_p11, %p177_p9  ;;  %s1096_s4 = scalar_lea.hbm %s1362_s18, 1024 }
  0x35   : > { %p1097_p1 = scmp.ne.s32.totalorder %s1362_s18, %s1096_s4  ;;  %s1101_s29 = scalar_lea.hbm %s1524_s1, 2048 }
  0x36   : > { %p1102_p2 = scmp.lt.u32.totalorder %s1362_s18, %s1524_s1  ;;  %p1103_p5 = scmp.lt.u32.totalorder %s1101_s29, %s1096_s4 }
  0x37   : > { %p1099_p6 = pnand %p1097_p1, %p1068_p3  ;;  %p1105_p7 = scmp.lt.u32.totalorder %s1096_s4, %s1362_s18 }
  0x38   : > { %p1104_p4 = por %p1103_p5, %p1102_p2 }
  0x39   : > { %p1100_p13 = pneg %p1099_p6 }
  0x3a   : > { %p1106_p10 = por %p1105_p7, %p1104_p4 }
  0x3c   : > { %p1107_p9 = pnand %p1106_p10, %p1100_p13 }
  0x3e   : > { %1110 = shalt.err (!%p1107_p9)
}
  0x3f   : > { %s1111_s26 = scalar_lea.vmem %s1372_s28, 1024  ;;  %s1217_s16 = smov [#allocation5]  }
  0x40   : > { %p1112_p11 = scmp.ne.s32.totalorder %s1372_s28, %s1111_s26  ;;  %s1116_s20 = sshll.u32 %s1217_s16, 4  ;;  %s1117_s20 = int_to_ptr.vmem [resolvable:$false] %s1116_s20 }
  0x41   : > { %s1118_s27 = scalar_lea.vmem %s1117_s20, 2048  ;;  %p1119_p8 = scmp.lt.s32.totalorder %s1372_s28, %s1117_s20 }
  0x42   : > { %p1114_p1 = pnand %p1112_p11, %p1068_p3  ;;  %p1120_p2 = scmp.lt.s32.totalorder %s1118_s27, %s1111_s26 }
  0x44   : > { %p1115_p6 = pneg %p1114_p1  ;;  %p1121_p5 = por %p1120_p2, %p1119_p8 }
  0x46   : > { %p1122_p4 = pnand %p1121_p5, %p1115_p6 }
  0x48   : > { %1125 = shalt.err (!%p1122_p4)
}
  0x49   : > { %989 = dma.hbm_to_vmem [thread:$0]  (!%p1320_p0), %s1362_s18, 1024, %s1372_s28, %s158_s30, %s1215_s7, %s1215_s7, %s1216_s8  }
  0x4a   : > { %181 = sbr.rel (%p1366_p12) target bundleno = 345 (0x159), region = 28  ;;  %s1406_s4 = sand.u32 (!%p1366_p12), 1, %s1196_s10  }
  0x4b   : > { %s1409_s6 = sshll.u32 (!%p1366_p12), %s1406_s4, 6  ;;  %s184_s5 = scalar_lea.sflag (!%p1366_p12), [#allocation3], %s1406_s4 }
  0x4c   : > { %s1413_s29 = scalar_lea.vmem (!%p1366_p12), [#allocation2], %s1409_s6  ;;  %p1535_p8 = scmp.ne.s32.totalorder (!%p1366_p12), %s1529_s21, 0 }
  0x51   : > { %1179 = dma.done.wait (%p1535_p8), %s184_s5, 1024  }
  0x52   : > { %1181 = vsyncadd (%p1535_p8), %s184_s5, 4294966272  ;;  %s193_s25 = scalar_lea.sflag [#allocation6], %s1406_s4  ;;  %s1421_s7 = scalar_lea.vmem [#allocation5], %s1409_s6 }
  0x53   : > { %1183 = dma.done.wait (%p1535_p8), %s193_s25, 1024  }
  0x54   : > { %1185 = vsyncadd (%p1535_p8), %s193_s25, 4294966272  ;;  %v1218_v0 = vmov 0.0   ;;  %vm1219_vm0 = vmmov 0   ;;  %v1050_v1 = vld [vmem:[%s1421_s7 + $0x8] sm:$0xff]   ;;  %v1051_v2 = vld [vmem:[%s1421_s7 + $0x18] sm:$0xff]   ;;  %vm271_vm1 = vcmask 130048  }
  0x55   : > { %913 = vmatprep.subr.bf16.mxu0 %v1218_v0  ;;  %919 = vmatprep.subr.bf16.mxu1 %v1218_v0  ;;  %v1052_v3 = vld [vmem:[%s1413_s29 + $0x8] sm:$0xff]   ;;  %v1053_v4 = vld [vmem:[%s1413_s29 + $0x18] sm:$0xff]   ;;  %v1058_v9 = vld [vmem:[%s1421_s7] sm:$0xff]   ;;  %vm709_vm2 = vcmask 261120   ;;  %s221_s21 = scalar_lea.vmem [#allocation7], %s1409_s6  ;;  %s896_s8 = sshll.u32 %s1204_s12, 10 }
  0x56   : > { %915 = vmatprep.mubr.msk.bf16.mxu0 %vm1219_vm0, %v1218_v0  ;;  %921 = vmatprep.mubr.msk.bf16.mxu1 %vm1219_vm0, %v1218_v0  ;;  %v1054_v5 = vld [vmem:[%s1421_s7 + $0x28] sm:$0xff]   ;;  %v1055_v6 = vld [vmem:[%s1421_s7 + $0x38] sm:$0xff]   ;;  %v1059_v10 = vld [vmem:[%s1421_s7 + $0x10] sm:$0xff]   ;;  %s735_s18 = sshll.u32 %s221_s21, 4  ;;  %s1469_s30 = scalar_lea.hbm %s1525_s2, %s896_s8  ;;  %s1471_s18 = int_to_ptr.vmem [resolvable:$true] %s735_s18 }
  0x57   : > { %914 = vmatpush3.bf16.msra.mxu0 %v1050_v1  ;;  %920 = vmatpush3.bf16.msra.mxu1 %v1051_v2  ;;  %v1056_v7 = vld [vmem:[%s1413_s29 + $0x28] sm:$0xff]   ;;  %v1057_v8 = vld [vmem:[%s1413_s29 + $0x38] sm:$0xff]   ;;  %v1060_v11 = vld [vmem:[%s1413_s29] sm:$0xff]   ;;  %s719_s12 = scalar_lea.sflag [#allocation4], %s1406_s4  ;;  %s1126_s3 = scalar_lea.vmem %s1471_s18, 1024 }
  0x58   : > { %925 = vmatprep.subr.bf16.mxu0 %v1218_v0  ;;  %931 = vmatprep.subr.bf16.mxu1 %v1218_v0  ;;  %v1061_v12 = vld [vmem:[%s1413_s29 + $0x10] sm:$0xff]   ;;  %v1062_v13 = vld [vmem:[%s1421_s7 + $0x20] sm:$0xff]   ;;  %p1127_p0 = scmp.ne.s32.totalorder %s1471_s18, %s1126_s3  ;;  %p1536_p3 = scmp.ne.s32.totalorder %s1530_s22, 0 }
  0x59   : > { %v1063_v14 = vld [vmem:[%s1421_s7 + $0x30] sm:$0xff]   ;;  %v1064_v15 = vld [vmem:[%s1413_s29 + $0x20] sm:$0xff]   ;;  %s1220_s15 = smov [#allocation7]  }
  0x5a   : > { %916 = vmatmul.mubr.msk.bf16.vlgmr.msra.gmra.mrb[0].mxu0 %vm271_vm1, %v1052_v3  ;;  %922 = vmatmul.mubr.msk.bf16.vlgmr.msra.gmra.mrb[0].mxu1 %vm271_vm1, %v1053_v4  ;;  %v1065_v16 = vld [vmem:[%s1413_s29 + $0x30] sm:$0xff]   ;;  %p1128_p12 = pnand %p1127_p0, %p1536_p3  ;;  %s1130_s26 = sshll.u32 %s1220_s15, 4  ;;  %s1131_s26 = int_to_ptr.vmem [resolvable:$false] %s1130_s26 }
  0x5b   : > { %926 = vmatpush3.bf16.msra.mxu0 %v1054_v5  ;;  %932 = vmatpush3.bf16.msra.mxu1 %v1055_v6  ;;  %s1132_s16 = scalar_lea.vmem %s1131_s26, 2048  ;;  %p1133_p7 = scmp.lt.s32.totalorder %s1471_s18, %s1131_s26 }
  0x5c   : > { %927 = vmatprep.mubr.msk.bf16.mxu0 %vm1219_vm0, %v1218_v0  ;;  %933 = vmatprep.mubr.msk.bf16.mxu1 %vm1219_vm0, %v1218_v0  ;;  %p1129_p13 = pneg %p1128_p12  ;;  %p1134_p10 = scmp.lt.s32.totalorder %s1132_s16, %s1126_s3 }
  0x5d   : > { %937 = vmatprep.subr.bf16.mxu0 %v1218_v0  ;;  %943 = vmatprep.subr.bf16.mxu1 %v1218_v0 }
  0x5e   : > { %p1135_p9 = por %p1134_p10, %p1133_p7 }
  0x60   : > { %p1136_p11 = pnand %p1135_p9, %p1129_p13 }
  0x62   : > { %928 = vmatmul.mubr.msk.bf16.vlgmr.msra.gmra.mrb[4].mxu0 %vm271_vm1, %v1056_v7  ;;  %934 = vmatmul.mubr.msk.bf16.vlgmr.msra.gmra.mrb[4].mxu1 %vm271_vm1, %v1057_v8 }
  0x63   : > { %938 = vmatpush3.bf16.msra.mxu0 %v1058_v9  ;;  %944 = vmatpush3.bf16.msra.mxu1 %v1059_v10 }
  0x64   : > { %939 = vmatprep.mubr.msk.bf16.mxu0 %vm1219_vm0, %v1218_v0  ;;  %945 = vmatprep.mubr.msk.bf16.mxu1 %vm1219_vm0, %v1218_v0 }
  0x65   : > { %949 = vmatprep.subr.bf16.mxu0 %v1218_v0  ;;  %955 = vmatprep.subr.bf16.mxu1 %v1218_v0 }
  0x6a   : > { %940 = vmatmul.mubr.msk.bf16.vlgmr.msra.gmra.mrb[0].mxu0 %vm271_vm1, %v1060_v11  ;;  %946 = vmatmul.mubr.msk.bf16.vlgmr.msra.gmra.mrb[0].mxu1 %vm271_vm1, %v1061_v12 }
  0x6b   : > { %950 = vmatpush3.bf16.msra.mxu0 %v1062_v13  ;;  %956 = vmatpush3.bf16.msra.mxu1 %v1063_v14 }
  0x6c   : > { %951 = vmatprep.mubr.msk.bf16.mxu0 %vm1219_vm0, %v1218_v0  ;;  %957 = vmatprep.mubr.msk.bf16.mxu1 %vm1219_vm0, %v1218_v0 }
  0x72   : > { %952 = vmatmul.mubr.msk.bf16.vlgmr.msra.gmra.mrb[4].mxu0 %vm271_vm1, %v1064_v15  ;;  %958 = vmatmul.mubr.msk.bf16.vlgmr.msra.gmra.mrb[4].mxu1 %vm271_vm1, %v1065_v16 }
 0x13d   : > { %v529_v17 = vpop.f32.mrb[0].mxu0  ;;  %v584_v19 = vpop.f32.mrb[0].mxu1 }
 0x13e   : > { %v701_v18 = vmax.f32 %v529_v17, 0.0  ;;  %v941_v20 = vpop.f32.mrb[1].mxu0  ;;  %v703_v21 = vmax.f32 %v584_v19, 0.0  ;;  %v947_v22 = vpop.f32.mrb[1].mxu1 }
 0x13f   : > { %v532_v23 = vpop.f32.mrb[2].mxu0  ;;  %v587_v25 = vpop.f32.mrb[2].mxu1 }
 0x140   : > { %710 = vst.msk [vmem:[%s221_s21] sm:$0xff] %vm709_vm2, %v701_v18  ;;  %v702_v24 = vmax.f32 %v532_v23, 0.0  ;;  %v942_v26 = vpop.f32.mrb[3].mxu0  ;;  %712 = vst.msk [vmem:[%s221_s21 + $0x10] sm:$0xff] %vm709_vm2, %v703_v21  ;;  %v704_v27 = vmax.f32 %v587_v25, 0.0  ;;  %v948_v28 = vpop.f32.mrb[3].mxu1 }
 0x142   : > { %711 = vst.msk [vmem:[%s221_s21 + $0x8] sm:$0xff] %vm709_vm2, %v702_v24  ;;  %713 = vst.msk [vmem:[%s221_s21 + $0x18] sm:$0xff] %vm709_vm2, %v704_v27 }
 0x145   : > { %v639_v29 = vpop.f32.mrb[4].mxu0  ;;  %v694_v31 = vpop.f32.mrb[4].mxu1 }
 0x146   : > { %v705_v30 = vmax.f32 %v639_v29, 0.0  ;;  %v953_v32 = vpop.f32.mrb[5].mxu0  ;;  %v707_v33 = vmax.f32 %v694_v31, 0.0  ;;  %v959_v34 = vpop.f32.mrb[5].mxu1 }
 0x147   : > { %v642_v35 = vpop.f32.mrb[6].mxu0  ;;  %v697_v37 = vpop.f32.mrb[6].mxu1 }
 0x148   : > { %714 = vst.msk [vmem:[%s221_s21 + $0x20] sm:$0xff] %vm709_vm2, %v705_v30  ;;  %v706_v36 = vmax.f32 %v642_v35, 0.0  ;;  %v954_v38 = vpop.f32.mrb[7].mxu0  ;;  %716 = vst.msk [vmem:[%s221_s21 + $0x30] sm:$0xff] %vm709_vm2, %v707_v33  ;;  %v708_v39 = vmax.f32 %v697_v37, 0.0  ;;  %v960_v40 = vpop.f32.mrb[7].mxu1 }
 0x14a   : > { %715 = vst.msk [vmem:[%s221_s21 + $0x28] sm:$0xff] %vm709_vm2, %v706_v36  ;;  %717 = vst.msk [vmem:[%s221_s21 + $0x38] sm:$0xff] %vm709_vm2, %v708_v39 }
 0x14b   : > { %1139 = shalt.err (!%p1136_p11)
}
 0x14c   : > { %s1140_s20 = scalar_lea.hbm %s1469_s30, 1024  ;;  %s1144_s5 = scalar_lea.hbm %s1525_s2, 2048 }
 0x14d   : > { %p1141_p1 = scmp.ne.s32.totalorder %s1469_s30, %s1140_s20  ;;  %p1145_p5 = scmp.lt.u32.totalorder %s1469_s30, %s1525_s2 }
 0x14e   : > { %p1146_p4 = scmp.lt.u32.totalorder %s1144_s5, %s1140_s20  ;;  %p1148_p0 = scmp.lt.u32.totalorder %s1140_s20, %s1469_s30 }
 0x14f   : > { %p1142_p6 = pnand %p1141_p1, %p1536_p3 }
 0x150   : > { %p1147_p8 = por %p1146_p4, %p1145_p5 }
 0x151   : > { %p1143_p2 = pneg %p1142_p6 }
 0x152   : > { %p1149_p12 = por %p1148_p0, %p1147_p8 }
 0x154   : > { %p1150_p13 = pnand %p1149_p12, %p1143_p2 }
 0x156   : > { %1153 = shalt.err (!%p1150_p13)
}
 0x157   : > { %s1221_s7 = smov 128   ;;  %s1222_s21 = smov 8  }
 0x158   : > { %981 = dma.vmem_to_hbm [thread:$0]  (%p1536_p3), %s1471_s18, 1024, %s1469_s30, %s719_s12, %s1221_s7, %s1221_s7, %s1222_s21  }
 0x159 PF: > { %s750_s8 = sand.u32 1, %s1192_s9   ;;  %p1537_p7 = scmp.ne.s32.totalorder %s1531_s24, 0 }
 0x15a   : > { %p1538_p10 = scmp.ge.s32.totalorder %s1212_s14, 2  ;;  %s751_s19 = scalar_lea.sflag [#allocation4], %s750_s8 }
 0x15c   : > { %p991_p9 = pnand %p1538_p10, %p1537_p7 }
 0x15e   : > { %1187 = dma.done.wait (!%p991_p9), %s751_s19, 1024  }
 0x15f   : > { %1189 = vsyncadd (!%p991_p9), %s751_s19, 4294966272  ;;  %s21_s14 = sadd.s32 1, %s1212_s14   ;;  %s1539_s9 = smov %s1196_s10 }
 0x160   : > { %p18_p11 = scmp.ge.s32.totalorder %s21_s14, 4   ;;  %s1540_s10 = smov %s1200_s11 }
 0x161   : > { %s1541_s11 = smov %s1294_s23  ;;  %s1542_s12 = smov %s1208_s13 }
 0x162   : > { %s1543_s13 = smov %s1545_s17  ;;  %20 = sbr.rel (!%p18_p11) target bundleno = 8 (0x8), region = 86 }
 0x169   :  { %756 = vsyncpa [#allocation3], 1 }
 0x16a   :  { %758 = vsyncpa [#allocation3 + $0x1], 1 }
 0x16b   :  { %759 = vsyncpa [#allocation6], 1 }
 0x16c   :  { %761 = vsyncpa [#allocation6 + $0x1], 1 }
 0x16d   :  { %762 = vsyncpa [#allocation4], 1 }
 0x16e   :  { %764 = vsyncpa [#allocation4 + $0x1], 1 }

</bundles_post_ra>
